<compile_context>
chip_gen: v5e
topology: v5e:2x2
jax: 0.10.0
libtpu: 0.0.40
codegen_flags: <defaults>
</compile_context>

<pallas_src>
import functools

import jax
import jax.numpy as jnp
from jax import lax
from jax.experimental import pallas as pl
from jax.experimental.pallas import tpu as pltpu


def _round_up(x, m):
    return (x + m - 1) // m * m


def conv_block_kernel(x_ref, w_ref, b_ref, o_ref, *, c_in, kernel_size, pool_k, pool_s):
    """One grid step = one block of b_blk batch elements (flattened on lanes).

    x_ref : (1, pool_s*C_in, W)  polyphase input: row r*C_in + c, lane seg*T + u
                                 holds x_pad[seg, c, u*pool_s + r]   (compute dtype)
    w_ref : (C_out, K*C_in)      conv weight with BN folded in, im2col layout
                                 (column index = tap*C_in + c)       (compute dtype)
    b_ref : (C_out, 1)           conv bias with BN folded in         (f32)
    o_ref : (1, C_out, W)        pooled output; lane seg*T + u = pooled pos u (f32)
    """
    x = x_ref[0]                               # (pool_s*C_in, W)
    w = w_ref[...]                             # (C_out, K*C_in)
    wl = x.shape[1]
    phases = [x[r * c_in:(r + 1) * c_in, :] for r in range(pool_s)]

    m = None
    for j in range(pool_k):                    # offset inside the pool window
        taps = []
        for k in range(kernel_size):           # conv tap
            r = (j + k) % pool_s               # which phase array
            a = (j + k) // pool_s              # lane shift inside the pooled domain
            v = phases[r]
            if a:
                v = pltpu.roll(v, shift=wl - a, axis=1)   # left shift by a lanes
            taps.append(v)
        # TODO(synk): for large C_in, switch to accumulating K per-tap dots instead
        # of materializing the (K*C_in, W) concatenation.
        col = jnp.concatenate(taps, axis=0)    # (K*C_in, W), compute dtype
        y = jnp.dot(w, col, preferred_element_type=jnp.float32)
        m = y if m is None else jnp.maximum(m, y)

    # Bias + ReLU after the pool max (per-channel constant bias and monotone ReLU
    # both commute with max), matching Conv1d -> BN -> ReLU -> MaxPool1d.
    o_ref[0] = jnp.maximum(m + b_ref[...], 0.0).astype(o_ref.dtype)
    # TODO(synk): nn.Dropout is identity in eval mode; train-mode RNG dropout
    # (PyTorch RNG stream) is not reproduced here.


def conv_block_forward(x, w, b, gamma, beta, mean, var, *,
                       padding, pool, eps=1e-5, lane_target=2048,
                       compute_dtype=jnp.bfloat16):
    n, c_in, l = x.shape
    c_out, _, k = w.shape
    pool_k, pool_s = pool

    l_pad = l + 2 * padding
    l_out = l_pad - k + 1
    assert l_out >= pool_k, "pool window larger than conv output"
    l_pool = (l_out - pool_k) // pool_s + 1
    a_max = (pool_k - 1 + k - 1) // pool_s     # max lane shift needed in pooled domain
    t_seg = l_pool + a_max                     # lanes per batch segment
    l_ext = t_seg * pool_s                     # phase-aligned time extent

    # --- fold BatchNorm (eval, running stats) into the conv weight / bias ---
    scale = gamma.astype(jnp.float32) * lax.rsqrt(var.astype(jnp.float32) + eps)
    w_f = w.astype(jnp.float32) * scale[:, None, None]
    b_f = ((b.astype(jnp.float32) - mean.astype(jnp.float32)) * scale
           + beta.astype(jnp.float32)).reshape(c_out, 1)
    # im2col weight layout: column index = tap * C_in + in_channel
    w_mat = jnp.transpose(w_f, (0, 2, 1)).reshape(c_out, k * c_in).astype(compute_dtype)

    # --- batch blocking: b_blk elements folded onto the lane axis ---
    b_blk = max(1, min(n, lane_target // max(t_seg, 1)))
    if n > 1:                                  # >= 2 grid blocks for v7x's 2 TensorCores
        b_blk = min(b_blk, -(-n // 2))
    n_blocks = pl.cdiv(n, b_blk)
    n_pad = n_blocks * b_blk
    w_lanes = _round_up(b_blk * t_seg, 256)    # 256-aligned lanes (full MXU tile v6e/v7x)

    # --- polyphase relayout (one fused XLA copy):
    #     (n, C_in, L) -> (n_blocks, pool_s*C_in, b_blk*t_seg), zero padded on lanes ---
    x_p = jnp.pad(x, ((0, n_pad - n), (0, 0), (padding, padding)))
    if l_ext >= l_pad:
        x_p = jnp.pad(x_p, ((0, 0), (0, 0), (0, l_ext - l_pad)))
    else:
        x_p = x_p[:, :, :l_ext]
    x_t = (x_p.reshape(n_blocks, b_blk, c_in, t_seg, pool_s)
              .transpose(0, 4, 2, 1, 3)                  # (blk, phase, c, seg, t)
              .reshape(n_blocks, pool_s * c_in, b_blk * t_seg))
    x_t = jnp.pad(x_t, ((0, 0), (0, 0), (0, w_lanes - b_blk * t_seg)))
    x_t = x_t.astype(compute_dtype)

    kernel = functools.partial(conv_block_kernel, c_in=c_in, kernel_size=k,
                               pool_k=pool_k, pool_s=pool_s)

    out = pl.pallas_call(
        kernel,
        out_shape=jax.ShapeDtypeStruct((n_blocks, c_out, w_lanes), jnp.float32),
        grid=(n_blocks,),
        in_specs=[
            pl.BlockSpec((1, pool_s * c_in, w_lanes), lambda i: (i, 0, 0)),  # input block
            pl.BlockSpec((c_out, k * c_in), lambda i: (0, 0)),               # folded weight
            pl.BlockSpec((c_out, 1), lambda i: (0, 0)),                      # folded bias
        ],
        out_specs=pl.BlockSpec((1, c_out, w_lanes), lambda i: (i, 0, 0)),
        compiler_params=pltpu.CompilerParams(
            dimension_semantics=("parallel",),
            vmem_limit_bytes=32 * 1024 * 1024),
    )(x_t, w_mat, b_f)

    out = (out[:, :, :b_blk * t_seg]
              .reshape(n_blocks, c_out, b_blk, t_seg)[..., :l_pool]
              .transpose(0, 2, 1, 3)
              .reshape(n_pad, c_out, l_pool))
    return out[:n].astype(x.dtype)


def ref_forward(x, w, b, gamma, beta, mean, var, *, padding, pool, eps=1e-5):
    """Pure-JAX reference of the PyTorch forward (eval mode)."""
    pool_k, pool_s = pool
    y = lax.conv_general_dilated(x, w, window_strides=(1,),
                                 padding=[(padding, padding)],
                                 dimension_numbers=("NCH", "OIH", "NCH"))
    y = y + b[None, :, None]
    y = (y - mean[None, :, None]) * lax.rsqrt(var[None, :, None] + eps) \
        * gamma[None, :, None] + beta[None, :, None]
    y = jnp.maximum(y, 0.0)
    l_out = y.shape[-1]
    l_pool = (l_out - pool_k) // pool_s + 1
    wins = jnp.stack([y[:, :, t * pool_s: t * pool_s + pool_k]
                      for t in range(l_pool)], axis=2)
    return wins.max(-1)


def _run_case(seed, n, c_in, l, c_out, k, padding, pool, compute_dtype, atol, rtol):
    key = jax.random.PRNGKey(seed)
    kx, kw, kb, kg, kbt, km, kv = jax.random.split(key, 7)
    x = jax.random.normal(kx, (n, c_in, l), jnp.float32)
    w = jax.random.normal(kw, (c_out, c_in, k), jnp.float32) * 0.3
    b = jax.random.normal(kb, (c_out,), jnp.float32) * 0.1
    gamma = 1.0 + 0.1 * jax.random.normal(kg, (c_out,), jnp.float32)
    beta = 0.1 * jax.random.normal(kbt, (c_out,), jnp.float32)
    mean = 0.1 * jax.random.normal(km, (c_out,), jnp.float32)
    var = jnp.abs(jax.random.normal(kv, (c_out,), jnp.float32)) + 0.5

    ref = ref_forward(x, w, b, gamma, beta, mean, var, padding=padding, pool=pool)
    out = conv_block_forward(x, w, b, gamma, beta, mean, var, padding=padding,
                             pool=pool, compute_dtype=compute_dtype)
    out = jax.block_until_ready(out)
    assert out.shape == ref.shape, (out.shape, ref.shape)
    err = float(jnp.max(jnp.abs(out - ref)))
    assert jnp.allclose(out, ref, atol=atol, rtol=rtol), err


if __name__ == "__main__":
    # ConvBlock(input_size=4, out_size=8, kernel_size=3, padding=1, pool=(2, 2),
    # dropout=0.1), input (N=2, C=4, L=16).
    # Exact-math path (f32 MXU operands), multi-block grid (n_blocks = 2).
    _run_case(0, 2, 4, 16, 8, 3, 1, (2, 2), jnp.float32, 1e-3, 1e-3)
    # Same config on the default fast path (bf16 MXU operands, f32 accumulation).
    _run_case(0, 2, 4, 16, 8, 3, 1, (2, 2), jnp.bfloat16, 5e-2, 5e-2)
    # Regression: b_blk > 1, n not a multiple of b_blk, pool_k != pool_s,
    # (l_out - pool_k) % pool_s != 0.
    _run_case(1, 3, 4, 16, 8, 3, 1, (3, 2), jnp.bfloat16, 5e-2, 5e-2)
    # Regression: padding = 0, pool stride > pool kernel, phase-extent truncation,
    # non-power-of-two channel counts.
    _run_case(2, 5, 3, 19, 6, 4, 0, (2, 3), jnp.bfloat16, 5e-2, 5e-2)
    print("KERNEL_OK")
</pallas_src>

<mosaic_0001>
module attributes {stable_mosaic.version = 11 : i64} {
  func.func @conv_block_kernel(%arg0: i32, %arg1: memref<1x8x256xf32, #tpu.memory_space<vmem>>, %arg2: memref<8x12xf32, #tpu.memory_space<vmem>>, %arg3: memref<8x1xf32, #tpu.memory_space<vmem>>, %arg4: memref<1x8x256xf32, #tpu.memory_space<vmem>>) attributes {dimension_semantics = [#tpu.dimension_semantics<parallel>], iteration_bounds = array<i64: 2>, scalar_prefetch = 0 : i64, scratch_operands = 0 : i64, tpu.core_type = #tpu.core_type<tc>, window_params = [{transform_indices = @transform_0, window_bounds = array<i64: 1, 8, 256>}, {pipeline_mode = #tpu.pipeline_mode<synchronous>, transform_indices = @transform_1, window_bounds = array<i64: 8, 12>}, {pipeline_mode = #tpu.pipeline_mode<synchronous>, transform_indices = @transform_2, window_bounds = array<i64: 8, 1>}, {transform_indices = @transform_3, window_bounds = array<i64: 1, 8, 256>}]} {
    %c0 = arith.constant 0 : index
    %c0_0 = arith.constant 0 : index
    %c0_1 = arith.constant 0 : index
    %0 = vector.load %arg1[%c0, %c0_0, %c0_1] : memref<1x8x256xf32, #tpu.memory_space<vmem>>, vector<1x8x256xf32>
    %1 = vector.shape_cast %0 : vector<1x8x256xf32> to vector<8x256xf32>
    %c0_2 = arith.constant 0 : index
    %c0_3 = arith.constant 0 : index
    %2 = vector.load %arg2[%c0_2, %c0_3] : memref<8x12xf32, #tpu.memory_space<vmem>>, vector<8x12xf32>
    %3 = vector.extract_strided_slice %1 {offsets = [0, 0], sizes = [4, 256], strides = [1, 1]} : vector<8x256xf32> to vector<4x256xf32>
    %4 = vector.extract_strided_slice %1 {offsets = [4, 0], sizes = [4, 256], strides = [1, 1]} : vector<8x256xf32> to vector<4x256xf32>
    %c255_i32 = arith.constant 255 : i32
    %5 = tpu.dynamic_rotate %3 by %c255_i32 dim 1 : vector<4x256xf32>, i32 -> vector<4x256xf32>
    %6 = tpu.concatenate %3, %4, %5 in 0 : vector<4x256xf32>, vector<4x256xf32>, vector<4x256xf32> -> vector<12x256xf32>
    %cst = arith.constant dense<0.000000e+00> : vector<8x256xf32>
    %7 = tpu.matmul %2, %6, %cst {dimension_numbers = #tpu.dot_dimension_numbers<[1], [0], [0], [1], [0, 0, 1, 1], [], []>} : vector<8x12xf32>, vector<12x256xf32>, vector<8x256xf32> -> vector<8x256xf32>
    %c255_i32_4 = arith.constant 255 : i32
    %8 = tpu.dynamic_rotate %3 by %c255_i32_4 dim 1 : vector<4x256xf32>, i32 -> vector<4x256xf32>
    %c255_i32_5 = arith.constant 255 : i32
    %9 = tpu.dynamic_rotate %4 by %c255_i32_5 dim 1 : vector<4x256xf32>, i32 -> vector<4x256xf32>
    %10 = tpu.concatenate %4, %8, %9 in 0 : vector<4x256xf32>, vector<4x256xf32>, vector<4x256xf32> -> vector<12x256xf32>
    %cst_6 = arith.constant dense<0.000000e+00> : vector<8x256xf32>
    %11 = tpu.matmul %2, %10, %cst_6 {dimension_numbers = #tpu.dot_dimension_numbers<[1], [0], [0], [1], [0, 0, 1, 1], [], []>} : vector<8x12xf32>, vector<12x256xf32>, vector<8x256xf32> -> vector<8x256xf32>
    %12 = arith.maximumf %7, %11 : vector<8x256xf32>
    %c0_7 = arith.constant 0 : index
    %c0_8 = arith.constant 0 : index
    %13 = vector.load %arg3[%c0_7, %c0_8] : memref<8x1xf32, #tpu.memory_space<vmem>>, vector<8x1xf32>
    %14 = vector.broadcast %13 : vector<8x1xf32> to vector<8x256xf32>
    %15 = arith.addf %12, %14 : vector<8x256xf32>
    %cst_9 = arith.constant 0.000000e+00 : f32
    %16 = vector.broadcast %cst_9 : f32 to vector<8x256xf32>
    %17 = arith.maximumf %15, %16 : vector<8x256xf32>
    %c0_10 = arith.constant 0 : index
    %c0_11 = arith.constant 0 : index
    %c0_12 = arith.constant 0 : index
    %18 = vector.load %arg4[%c0_10, %c0_11, %c0_12] : memref<1x8x256xf32, #tpu.memory_space<vmem>>, vector<1x8x256xf32>
    %19 = vector.shape_cast %18 : vector<1x8x256xf32> to vector<8x256xf32>
    %20 = vector.shape_cast %17 : vector<8x256xf32> to vector<1x8x256xf32>
    tpu.vector_store %arg4[%c0_10, %c0_11, %c0_12], %20 {strides = array<i32>} : memref<1x8x256xf32, #tpu.memory_space<vmem>>, vector<1x8x256xf32>,
    return
  }
  func.func @transform_0(%arg0: i32) -> (i32, i32, i32) {
    %c0_i32 = arith.constant 0 : i32
    %c0_i32_0 = arith.constant 0 : i32
    %c0_i32_1 = arith.constant 0 : i32
    return %arg0, %c0_i32, %c0_i32_0 : i32, i32, i32
  }
  func.func @transform_1(%arg0: i32) -> (i32, i32) {
    %c0_i32 = arith.constant 0 : i32
    %c0_i32_0 = arith.constant 0 : i32
    %c0_i32_1 = arith.constant 0 : i32
    return %c0_i32, %c0_i32_0 : i32, i32
  }
  func.func @transform_2(%arg0: i32) -> (i32, i32) {
    %c0_i32 = arith.constant 0 : i32
    %c0_i32_0 = arith.constant 0 : i32
    %c0_i32_1 = arith.constant 0 : i32
    return %c0_i32, %c0_i32_0 : i32, i32
  }
  func.func @transform_3(%arg0: i32) -> (i32, i32, i32) {
    %c0_i32 = arith.constant 0 : i32
    %c0_i32_0 = arith.constant 0 : i32
    %c0_i32_1 = arith.constant 0 : i32
    return %arg0, %c0_i32, %c0_i32_0 : i32, i32, i32
  }
}

</mosaic_0001>

<bundles_post_ra>
// kernel: tpu_custom_call.1
= control target key start
LH: loop header
LB: loop body
LE: loop exit
PB: predicated region body
PF: predicated region fallthrough
CT: control target
= control target key end

     0   :  { %8 = vsyncpa [#allocation3], 0  ;;  %s748_s0 = inlined_call_operand.hbm [shape: f32[2,8,256], index: 0, kind: input, shape index: {}]   ;;  %s749_s1 = inlined_call_operand.vmem [shape: f32[8,12], index: 1, kind: input, shape index: {}]   ;;  %s750_s2 = inlined_call_operand.vmem [shape: f32[8,1], index: 2, kind: input, shape index: {}]   ;;  %s751_s3 = inlined_call_operand.hbm [shape: f32[2,8,256], index: 3, kind: output, shape index: {}]  }
   0x1   :  { %10 = vsyncpa [#allocation3 + $0x1], 0 }
   0x2   :  { %11 = vsyncpa [#allocation4], 0 }
   0x3   :  { %13 = vsyncpa [#allocation4 + $0x1], 0  ;;  %s611_s12 = smov 0   ;;  %s613_s13 = smov 0  }
   0x4   :  { %s615_s14 = smov 0   ;;  %s617_s15 = smov 0  }
   0x5 LB: > { %s632_s16 = sadd.s32 4294967295, %s587_s15   ;;  %s417_s17 = sadd.s32 4294967294, %s587_s15   ;;  %s587_s15 = sphi %s617_s15, %s761_s15   ;;  %s583_s14 = sphi %s615_s14, %s760_s14   ;;  %s579_s13 = sphi %s613_s13, %s759_s13   ;;  %s575_s12 = sphi %s611_s12, %s758_s12  }
   0x6   : > { %s636_s18 = sadd.s32 1, %s587_s15   ;;  %s26_s19 = sadd.s32 1, %s583_s14 }
   0x7   : > { %s23_s20 = ssub.s32 %s587_s15, %s636_s18  ;;  %p33_p0 = scmp.ne.s32.totalorder %s583_s14, %s579_s13 }
   0x8   : > { %p24_p1 = scmp.eq.s32.totalorder %s23_s20, 0  ;;  %p34_p2 = scmp.eq.s32.totalorder %s587_s15, 0 }
   0x9   : > { %p39_p3 = scmp.ne.s32.totalorder %s579_s13, %s575_s12  ;;  %p40_p4 = scmp.eq.s32.totalorder %s632_s16, 0 }
   0xa   : > { %s648_s21 = scalar_select %p24_p1, %s583_s14, %s26_s19  }
   0xb   : > { %p650_p5 = por %p34_p2, %p33_p0  ;;  %p654_p6 = por %p40_p4, %p39_p3 }
   0xc   : > { %p105_p7 = scmp.eq.s32.totalorder %s632_s16, 1  ;;  %p111_p8 = scmp.eq.s32.totalorder %s417_s17, 1 }
   0xd   : > { %p453_p10 = scmp.lt.s32.totalorder %s587_s15, 2  ;;  %s137_s26 = sand.u32 1, %s583_s14  }
   0xe   : > { %p661_p11 = por %p105_p7, %p33_p0  ;;  %p665_p12 = por %p111_p8, %p39_p3 }
   0xf   : > { %s439_s27 = sshll.u32 %s587_s15, 4  ;;  %s420_s28 = sshll.u32 %s137_s26, 4 }
  0x10   : > { %s146_s4 = scalar_lea.hbm %s748_s0, %s439_s27  ;;  %s141_s6 = scalar_lea.vmem [#allocation2], %s420_s28 }
  0x11   : > { %s148_s5 = sshll.u32 %s146_s4, 4  ;;  %s150_s7 = sshll.u32 %s141_s6, 4  ;;  %s149_s5 = int_to_ptr.hbm [resolvable:$true] %s148_s5  ;;  %s151_s7 = int_to_ptr.vmem [resolvable:$true] %s150_s7 }
  0x12   : > { %p676_p13 = pnand %p453_p10, %p650_p5  ;;  %p423_p0 = scmp.ge.s32.totalorder %s587_s15, 1 }
  0x13   : > { %p155_p1 = scmp.lt.s32.totalorder %s587_s15, 3  ;;  %s138_s9 = scalar_lea.sflag [#allocation3], %s137_s26 }
  0x14   : > { %s491_s10 = sshra.s32 %s149_s5, 4  ;;  %p495_p3 = pneg %p676_p13  ;;  %s492_s10 = int_to_ptr.hbm [resolvable:$true] %s491_s10 }
  0x15   : > { %s493_s11 = scalar_lea.hbm %s492_s10, 16  ;;  %s498_s20 = scalar_lea.hbm %s748_s0, 32 }
  0x16   : > { %p494_p2 = scmp.ne.s32.totalorder %s492_s10, %s493_s11  ;;  %p499_p5 = scmp.lt.s32.totalorder %s492_s10, %s748_s0 }
  0x17   : > { %p500_p8 = scmp.lt.s32.totalorder %s498_s20, %s493_s11 }
  0x18   : > { %p496_p4 = pnand %p495_p3, %p494_p2 }
  0x19   : > { %p501_p10 = por %p500_p8, %p499_p5 }
  0x1a   : > { %p497_p7 = pneg %p496_p4 }
  0x1c   : > { %p502_p9 = pnand %p501_p10, %p497_p7 }
  0x1e   : > { %505 = shalt.err (!%p502_p9)
}
  0x1f   : > { %448 = dma.hbm_to_vmem [thread:$0]  (!%p676_p13), %s149_s5, 256, %s151_s7, %s138_s9  }
  0x20   : > { %p156_p2 = pnand %p423_p0, %p155_p1 }
  0x21   : > { %s697_s26 = sand.u32 (!%p156_p2), 1, %s579_s13  }
  0x22   : > { %159 = sbr.rel (%p156_p2) target bundleno = 312 (0x138), region = 32  ;;  %s424_s28 = sshll.u32 (!%p156_p2), %s697_s26, 4 }
  0x23   : > { %s162_s29 = scalar_lea.sflag (!%p156_p2), [#allocation3], %s697_s26  ;;  %s165_s30 = scalar_lea.vmem (!%p156_p2), [#allocation2], %s424_s28 }
  0x27   : > { %566 = dma.done.wait (%p654_p6), %s162_s29, 256  }
  0x28   : > { %568 = vsyncadd (%p654_p6), %s162_s29, 4294967040  ;;  %v189_v0 = vld [vmem:[%s165_s30] sm:$0xff]  ;;  %s589_s4 = smov 127   ;;  %v190_v2 = vld [vmem:[%s165_s30 + $0x8] sm:$0xff]  ;;  %v590_v5 = vmov 0   ;;  %v196_v6 = vlaneseq  ;;  %vm205_vm1 = vcmask 1043456  }
  0x29   : > { %192 = vrot.lane.b32.xlu0 %v189_v0, %s589_s4  ;;  %v254_v1 = vrot.slane %v189_v0, 4  ;;  %v255_v3 = vrot.slane %v190_v2, 4  ;;  %v318_v4 = vld [vmem:[%s750_s2] sm:$0xff]  ;;  %489 = vset.pattern.permute.xlu2 %v590_v5  ;;  %vm201_vm2 = vcmask 97280   ;;  %s440_s8 = sshll.u32 %s632_s16, 4  ;;  %s188_s17 = scalar_lea.vmem [#allocation5], %s424_s28 }
  0x2a   : > { %490 = vset.pattern.permute.xlu0 %v590_v5  ;;  %321 = vperm.xlu2 %489, %v318_v4   ;;  %v197_v9 = vand.u32 127, %v196_v6  ;;  %v191_v20 = vld [vmem:[%s749_s1] sm:$0xff]  ;;  %s342_s11 = scalar_lea.hbm %s751_s3, %s440_s8  ;;  %s344_s19 = sshll.u32 %s188_s17, 4  ;;  %s345_s19 = int_to_ptr.vmem [resolvable:$true] %s344_s19 }
  0x2b   : > { %258 = vrot.lane.b32.xlu1 %v254_v1, %s589_s4  ;;  %s346_s20 = sshll.u32 %s342_s11, 4  ;;  %s331_s16 = scalar_lea.sflag [#allocation4], %s697_s26  ;;  %s347_s20 = int_to_ptr.hbm [resolvable:$true] %s346_s20 }
  0x2c   : > { %vm198_vm0 = vcmp.lt.s32.totalorder %v197_v9, 127  ;;  %s535_s22 = sshra.s32 %s347_s20, 4  ;;  %s541_s28 = scalar_lea.hbm %s751_s3, 32  ;;  %s536_s22 = int_to_ptr.hbm [resolvable:$true] %s535_s22 }
  0x2d   : > { %s537_s27 = scalar_lea.hbm %s536_s22, 16  ;;  %p542_p0 = scmp.lt.s32.totalorder %s536_s22, %s751_s3 }
  0x2e   : > { %p538_p6 = scmp.ne.s32.totalorder %s536_s22, %s537_s27  ;;  %p543_p1 = scmp.lt.s32.totalorder %s541_s28, %s537_s27 }
  0x30   : > { %p539_p9 = pnand %p538_p6, %p661_p11  ;;  %p544_p3 = por %p543_p1, %p542_p0 }
  0x31   : > { %194 = vrot.lane.b32.xlu0 %v190_v2, %s589_s4 }
  0x32   : > { %p540_p13 = pneg %p539_p9 }
  0x33   : > { %260 = vrot.lane.b32.xlu1 %v255_v3, %s589_s4 }
  0x34   : > { %p545_p4 = pnand %p544_p3, %p540_p13 }
  0x84   : > { %v322_v23 = vpop.permute.xlu2 %321 }
  0x9b   : > { %v193_v7 = vpop.permute.xlu0 %192 }
  0x9d   : > { %v259_v8 = vpop.permute.xlu1 %258 }
  0xa3   : > { %v195_v10 = vpop.permute.xlu0 %194 }
  0xa4   : > { %v199_v11 = vsel %vm198_vm0, %v193_v7, %v195_v10  ;;  %v200_v12 = vsel %vm198_vm0, %v195_v10, %v193_v7 }
  0xa5   : > { %426 = vmatpush.msk.msra.mxu0 %vm205_vm1, %v199_v11  ;;  %v264_v13 = vrot.slane %v199_v11, 4  ;;  %428 = vmatpush.msk.msra.mxu1 %vm205_vm1, %v200_v12  ;;  %v265_v14 = vrot.slane %v200_v12, 4  ;;  %v261_v15 = vpop.permute.xlu1 %260 }
  0xa6   : > { %v262_v16 = vsel %vm198_vm0, %v259_v8, %v261_v15  ;;  %v263_v17 = vsel %vm198_vm0, %v261_v15, %v259_v8 }
  0xa7   : > { %430 = vmatpush.msk.msra.mxu2 %vm205_vm1, %v262_v16  ;;  %432 = vmatpush.msk.msra.mxu3 %vm205_vm1, %v263_v17  ;;  %v268_v18 = vsel %vm205_vm1, %v254_v1, %v264_v13  ;;  %v269_v19 = vsel %vm205_vm1, %v255_v3, %v265_v14 }
  0xa8   : > { %227 = vmatpush.msra.mxu0 %v189_v0  ;;  %247 = vmatpush.msra.mxu1 %v190_v2 }
  0xa9   : > { %291 = vmatpush.msra.mxu2 %v268_v18  ;;  %311 = vmatpush.msra.mxu3 %v269_v19 }
  0xaa   : > { %431 = vmatmul.msk.f32.vlgmr.msra.gmra.mxu2 %vm201_vm2, %v191_v20  ;;  %433 = vmatmul.msk.f32.vlgmr.msra.gmra.mxu3 %vm201_vm2, %v191_v20 }
  0xab   : > { %427 = vmatmul.msk.f32.vlgmr.msra.gmra.mxu0 %vm201_vm2, %v191_v20  ;;  %429 = vmatmul.msk.f32.vlgmr.msra.gmra.mxu1 %vm201_vm2, %v191_v20 }
 0x128   : > { %v229_v21 = vpop.f32.mrf.mxu0  ;;  %v249_v22 = vpop.f32.mrf.mxu1 }
 0x12d   : > { %v293_v24 = vpop.f32.mrf.mxu2  ;;  %v313_v25 = vpop.f32.mrf.mxu3 }
 0x12e   : > { %v316_v26 = vmax.f32 %v229_v21, %v293_v24  ;;  %v317_v27 = vmax.f32 %v249_v22, %v313_v25 }
 0x130   : > { %v324_v28 = vadd.f32 %v322_v23, %v316_v26  ;;  %v325_v29 = vadd.f32 %v322_v23, %v317_v27 }
 0x132   : > { %v326_v30 = vmax.f32 %v324_v28, 0.0  ;;  %v327_v31 = vmax.f32 %v325_v29, 0.0 }
 0x134   : > { %328 = vst [vmem:[%s188_s17] sm:$0xff] %v326_v30 }
 0x135   : > { %329 = vst [vmem:[%s188_s17 + $0x8] sm:$0xff] %v327_v31 }
 0x136   : > { %548 = shalt.err (!%p545_p4)
}
 0x137   : > { %443 = dma.vmem_to_hbm [thread:$0]  (%p661_p11), %s345_s19, 256, %s347_s20, %s331_s16  }
 0x138 PF: > { %s358_s26 = sand.u32 1, %s575_s12   ;;  %p757_p7 = scmp.ge.s32.totalorder %s587_s15, 2 }
 0x139   : > { %s359_s6 = scalar_lea.sflag [#allocation4], %s358_s26 }
 0x13a   : > { %p450_p5 = pnand %p757_p7, %p665_p12 }
 0x13c   : > { %p451_p8 = pneg %p450_p5 }
 0x13e   : > { %570 = dma.done.wait (%p451_p8), %s359_s6, 256  }
 0x13f   : > { %572 = vsyncadd (%p451_p8), %s359_s6, 4294967040  ;;  %p16_p10 = scmp.ge.s32.totalorder %s636_s18, 4   ;;  %s758_s12 = smov %s579_s13 }
 0x140   : > { %s759_s13 = smov %s583_s14  ;;  %s760_s14 = smov %s648_s21 }
 0x141   : > { %s761_s15 = smov %s636_s18  ;;  %18 = sbr.rel (!%p16_p10) target bundleno = 5 (0x5), region = 77 }
 0x146   :  { %365 = vsyncpa [#allocation3], 1 }
 0x147   :  { %367 = vsyncpa [#allocation3 + $0x1], 1 }
 0x148   :  { %368 = vsyncpa [#allocation4], 1 }
 0x149   :  { %370 = vsyncpa [#allocation4 + $0x1], 1 }

</bundles_post_ra>
